<compile_context>
chip_gen: v5e
topology: v5e:2x2
jax: 0.10.0
libtpu: 0.0.40
codegen_flags: <defaults>
</compile_context>

<pallas_src>
import functools

import jax
import jax.numpy as jnp
from jax.experimental import pallas as pl
from jax.experimental.pallas import tpu as pltpu


def mlp_kernel(xT_ref, w2T_ref, b2_ref, w3T_ref, b3_ref, w4_ref, b4_ref, o_ref):
    """Feature-major tiles: (features, batch_tile); lanes = batch.  All f32."""
    x = xT_ref[...]          # (3,  TB)
    w2 = w2T_ref[...]        # (16, 3)
    w3 = w3T_ref[...]        # (32, 16)
    w4 = w4_ref[...]         # (32, 1)

    # fc2: Linear(3,16) + ReLU — unrolled over the 3 input features (VPU FMAs).
    h16 = b2_ref[...] + w2[:, 0:1] * x[0:1, :]
    for k in range(1, 3):
        h16 = h16 + w2[:, k:k + 1] * x[k:k + 1, :]
    h16 = jnp.maximum(h16, 0.0)                                     # (16, TB)

    # fc3: Linear(16,32) + ReLU — unrolled over the 16 inputs (VPU FMAs, f32).
    h32 = b3_ref[...] + w3[:, 0:1] * h16[0:1, :]
    for k in range(1, 16):
        h32 = h32 + w3[:, k:k + 1] * h16[k:k + 1, :]
    h32 = jnp.maximum(h32, 0.0)                                     # (32, TB)

    # fc4: Linear(32,1) — elementwise scale then sublane reduction (XLU).
    out = jnp.sum(h32 * w4, axis=0, keepdims=True) + b4_ref[...]    # (1, TB)
    o_ref[...] = out.astype(o_ref.dtype)


@functools.partial(jax.jit, static_argnames=("tb",))
def net_forward(x, params, *, tb=16384):
    """x: (batch, 3) float32 -> (batch, 1) float32. `tb` = max batch tile (lanes)."""
    assert tb % 128 == 0, "batch tile must be a multiple of 128 lanes"
    w2, b2, w3, b3, w4, b4 = params
    batch, in_dim = x.shape
    assert in_dim == 3

    # Batch tile: multiple of 128 lanes, capped at `tb`.  Aim for >= 2 grid
    # steps when the batch allows it so dimension_semantics=("parallel",)
    # actually feeds both v7x TensorCores.
    want_tiles = 2 if batch > 256 else 1
    tb_eff = min(tb, max(128, pl.cdiv(pl.cdiv(batch, want_tiles), 128) * 128))
    padded = pl.cdiv(batch, tb_eff) * tb_eff
    grid = (padded // tb_eff,)

    # Feature-major view of x; pad only the tail (fuseable) instead of
    # zeros + scatter.
    # TODO(synk): a batch-major BlockSpec + in-kernel (tb,3) transpose on the
    # idle XLU would remove this small wrapper HBM pass entirely.
    xT = x.astype(jnp.float32).T                                    # (3, batch)
    if padded != batch:
        xT = jnp.pad(xT, ((0, 0), (0, padded - batch)))

    w2T = w2.T                          # (16, 3)
    w3T = w3.T                          # (32, 16)
    w4c = w4.reshape(-1, 1)             # (32, 1)
    b2c, b3c, b4c = b2.reshape(-1, 1), b3.reshape(-1, 1), b4.reshape(-1, 1)

    const = lambda i: (0, 0)            # weights/biases: resident, never re-fetched

    outT = pl.pallas_call(
        mlp_kernel,
        out_shape=jax.ShapeDtypeStruct((1, padded), jnp.float32),
        grid_spec=pltpu.PrefetchScalarGridSpec(
            num_scalar_prefetch=0,
            grid=grid,
            in_specs=[
                pl.BlockSpec((in_dim, tb_eff), lambda i: (0, i)),   # xT tile
                pl.BlockSpec((16, 3), const),                       # W2^T
                pl.BlockSpec((16, 1), const),                       # b2
                pl.BlockSpec((32, 16), const),                      # W3^T
                pl.BlockSpec((32, 1), const),                       # b3
                pl.BlockSpec((32, 1), const),                       # W4 (column)
                pl.BlockSpec((1, 1), const),                        # b4
            ],
            out_specs=pl.BlockSpec((1, tb_eff), lambda i: (0, i)),  # lane-dense out
        ),
        compiler_params=pltpu.CompilerParams(
            dimension_semantics=("parallel",),   # batch tiles split across v7x's 2 TCs
        ),
    )(xT, w2T, b2c, w3T, b3c, w4c, b4c)

    return outT[:, :batch].T  # back to PyTorch layout (batch, 1)


def init_params(key):
    """Deterministic init matching PyTorch nn.Linear default (U[-1/sqrt(fan_in), ...])."""

    def linear(key, fan_in, fan_out):
        kw, kb = jax.random.split(key)
        bound = 1.0 / jnp.sqrt(float(fan_in))
        w = jax.random.uniform(kw, (fan_in, fan_out), jnp.float32, -bound, bound)
        b = jax.random.uniform(kb, (1, fan_out), jnp.float32, -bound, bound)
        return w, b

    k2, k3, k4 = jax.random.split(key, 3)
    w2, b2 = linear(k2, 3, 16)
    w3, b3 = linear(k3, 16, 32)
    w4, b4 = linear(k4, 32, 1)
    return (w2, b2, w3, b3, w4, b4)


def net_forward_ref(x, params):
    """Pure-JAX reference (batch-major) for correctness checking."""
    w2, b2, w3, b3, w4, b4 = params
    h = jnp.maximum(x @ w2 + b2, 0.0)
    h = jnp.maximum(h @ w3 + b3, 0.0)
    return h @ w4 + b4


if __name__ == "__main__":
    key = jax.random.PRNGKey(0)
    kx, kp = jax.random.split(key)
    params = init_params(kp)

    # Small smoke test: single 128-lane tile, grid=(1,).
    batch = 8
    x = jax.random.normal(kx, (batch, 3), dtype=jnp.float32)
    out = jax.block_until_ready(net_forward(x, params))
    ref = net_forward_ref(x, params)
    assert out.shape == (batch, 1), out.shape
    assert jnp.allclose(out, ref, atol=1e-5, rtol=1e-4), (out, ref)

    # Exercise padding + a 2-step grid (384 rows -> tile 256, padded 512, grid=(2,)).
    batch2 = 384
    x2 = jax.random.normal(jax.random.PRNGKey(1), (batch2, 3), dtype=jnp.float32)
    out2 = jax.block_until_ready(net_forward(x2, params))
    ref2 = net_forward_ref(x2, params)
    assert out2.shape == (batch2, 1), out2.shape
    assert jnp.allclose(out2, ref2, atol=1e-5, rtol=1e-4), "grid/padding path mismatch"

    print("KERNEL_OK")
</pallas_src>

<mosaic_0001>
module attributes {stable_mosaic.version = 11 : i64} {
  func.func @mlp_kernel(%arg0: i32, %arg1: memref<3x128xf32, #tpu.memory_space<vmem>>, %arg2: memref<16x3xf32, #tpu.memory_space<vmem>>, %arg3: memref<16x1xf32, #tpu.memory_space<vmem>>, %arg4: memref<32x16xf32, #tpu.memory_space<vmem>>, %arg5: memref<32x1xf32, #tpu.memory_space<vmem>>, %arg6: memref<32x1xf32, #tpu.memory_space<vmem>>, %arg7: memref<1x1xf32, #tpu.memory_space<vmem>>, %arg8: memref<1x128xf32, #tpu.memory_space<vmem>>) attributes {dimension_semantics = [#tpu.dimension_semantics<parallel>], iteration_bounds = array<i64: 1>, scalar_prefetch = 0 : i64, scratch_operands = 0 : i64, tpu.core_type = #tpu.core_type<tc>, window_params = [{transform_indices = @transform_0, window_bounds = array<i64: 3, 128>}, {pipeline_mode = #tpu.pipeline_mode<synchronous>, transform_indices = @transform_1, window_bounds = array<i64: 16, 3>}, {pipeline_mode = #tpu.pipeline_mode<synchronous>, transform_indices = @transform_2, window_bounds = array<i64: 16, 1>}, {pipeline_mode = #tpu.pipeline_mode<synchronous>, transform_indices = @transform_3, window_bounds = array<i64: 32, 16>}, {pipeline_mode = #tpu.pipeline_mode<synchronous>, transform_indices = @transform_4, window_bounds = array<i64: 32, 1>}, {pipeline_mode = #tpu.pipeline_mode<synchronous>, transform_indices = @transform_5, window_bounds = array<i64: 32, 1>}, {pipeline_mode = #tpu.pipeline_mode<synchronous>, transform_indices = @transform_6, window_bounds = array<i64: 1, 1>}, {transform_indices = @transform_7, window_bounds = array<i64: 1, 128>}]} {
    %c0 = arith.constant 0 : index
    %c0_0 = arith.constant 0 : index
    %0 = vector.load %arg1[%c0, %c0_0] : memref<3x128xf32, #tpu.memory_space<vmem>>, vector<3x128xf32>
    %c0_1 = arith.constant 0 : index
    %c0_2 = arith.constant 0 : index
    %1 = vector.load %arg2[%c0_1, %c0_2] : memref<16x3xf32, #tpu.memory_space<vmem>>, vector<16x3xf32>
    %c0_3 = arith.constant 0 : index
    %c0_4 = arith.constant 0 : index
    %2 = vector.load %arg4[%c0_3, %c0_4] : memref<32x16xf32, #tpu.memory_space<vmem>>, vector<32x16xf32>
    %c0_5 = arith.constant 0 : index
    %c0_6 = arith.constant 0 : index
    %3 = vector.load %arg6[%c0_5, %c0_6] : memref<32x1xf32, #tpu.memory_space<vmem>>, vector<32x1xf32>
    %c0_7 = arith.constant 0 : index
    %c0_8 = arith.constant 0 : index
    %4 = vector.load %arg3[%c0_7, %c0_8] : memref<16x1xf32, #tpu.memory_space<vmem>>, vector<16x1xf32>
    %5 = vector.extract_strided_slice %1 {offsets = [0, 0], sizes = [16, 1], strides = [1, 1]} : vector<16x3xf32> to vector<16x1xf32>
    %6 = vector.extract_strided_slice %0 {offsets = [0, 0], sizes = [1, 128], strides = [1, 1]} : vector<3x128xf32> to vector<1x128xf32>
    %7 = vector.broadcast %5 : vector<16x1xf32> to vector<16x128xf32>
    %8 = vector.broadcast %6 : vector<1x128xf32> to vector<16x128xf32>
    %9 = arith.mulf %7, %8 : vector<16x128xf32>
    %10 = vector.broadcast %4 : vector<16x1xf32> to vector<16x128xf32>
    %11 = arith.addf %10, %9 : vector<16x128xf32>
    %12 = vector.extract_strided_slice %1 {offsets = [0, 1], sizes = [16, 1], strides = [1, 1]} : vector<16x3xf32> to vector<16x1xf32>
    %13 = vector.extract_strided_slice %0 {offsets = [1, 0], sizes = [1, 128], strides = [1, 1]} : vector<3x128xf32> to vector<1x128xf32>
    %14 = vector.broadcast %12 : vector<16x1xf32> to vector<16x128xf32>
    %15 = vector.broadcast %13 : vector<1x128xf32> to vector<16x128xf32>
    %16 = arith.mulf %14, %15 : vector<16x128xf32>
    %17 = arith.addf %11, %16 : vector<16x128xf32>
    %18 = vector.extract_strided_slice %1 {offsets = [0, 2], sizes = [16, 1], strides = [1, 1]} : vector<16x3xf32> to vector<16x1xf32>
    %19 = vector.extract_strided_slice %0 {offsets = [2, 0], sizes = [1, 128], strides = [1, 1]} : vector<3x128xf32> to vector<1x128xf32>
    %20 = vector.broadcast %18 : vector<16x1xf32> to vector<16x128xf32>
    %21 = vector.broadcast %19 : vector<1x128xf32> to vector<16x128xf32>
    %22 = arith.mulf %20, %21 : vector<16x128xf32>
    %23 = arith.addf %17, %22 : vector<16x128xf32>
    %cst = arith.constant 0.000000e+00 : f32
    %24 = vector.broadcast %cst : f32 to vector<16x128xf32>
    %25 = arith.maximumf %23, %24 : vector<16x128xf32>
    %c0_9 = arith.constant 0 : index
    %c0_10 = arith.constant 0 : index
    %26 = vector.load %arg5[%c0_9, %c0_10] : memref<32x1xf32, #tpu.memory_space<vmem>>, vector<32x1xf32>
    %27 = vector.extract_strided_slice %2 {offsets = [0, 0], sizes = [32, 1], strides = [1, 1]} : vector<32x16xf32> to vector<32x1xf32>
    %28 = vector.extract_strided_slice %25 {offsets = [0, 0], sizes = [1, 128], strides = [1, 1]} : vector<16x128xf32> to vector<1x128xf32>
    %29 = vector.broadcast %27 : vector<32x1xf32> to vector<32x128xf32>
    %30 = vector.broadcast %28 : vector<1x128xf32> to vector<32x128xf32>
    %31 = arith.mulf %29, %30 : vector<32x128xf32>
    %32 = vector.broadcast %26 : vector<32x1xf32> to vector<32x128xf32>
    %33 = arith.addf %32, %31 : vector<32x128xf32>
    %34 = vector.extract_strided_slice %2 {offsets = [0, 1], sizes = [32, 1], strides = [1, 1]} : vector<32x16xf32> to vector<32x1xf32>
    %35 = vector.extract_strided_slice %25 {offsets = [1, 0], sizes = [1, 128], strides = [1, 1]} : vector<16x128xf32> to vector<1x128xf32>
    %36 = vector.broadcast %34 : vector<32x1xf32> to vector<32x128xf32>
    %37 = vector.broadcast %35 : vector<1x128xf32> to vector<32x128xf32>
    %38 = arith.mulf %36, %37 : vector<32x128xf32>
    %39 = arith.addf %33, %38 : vector<32x128xf32>
    %40 = vector.extract_strided_slice %2 {offsets = [0, 2], sizes = [32, 1], strides = [1, 1]} : vector<32x16xf32> to vector<32x1xf32>
    %41 = vector.extract_strided_slice %25 {offsets = [2, 0], sizes = [1, 128], strides = [1, 1]} : vector<16x128xf32> to vector<1x128xf32>
    %42 = vector.broadcast %40 : vector<32x1xf32> to vector<32x128xf32>
    %43 = vector.broadcast %41 : vector<1x128xf32> to vector<32x128xf32>
    %44 = arith.mulf %42, %43 : vector<32x128xf32>
    %45 = arith.addf %39, %44 : vector<32x128xf32>
    %46 = vector.extract_strided_slice %2 {offsets = [0, 3], sizes = [32, 1], strides = [1, 1]} : vector<32x16xf32> to vector<32x1xf32>
    %47 = vector.extract_strided_slice %25 {offsets = [3, 0], sizes = [1, 128], strides = [1, 1]} : vector<16x128xf32> to vector<1x128xf32>
    %48 = vector.broadcast %46 : vector<32x1xf32> to vector<32x128xf32>
    %49 = vector.broadcast %47 : vector<1x128xf32> to vector<32x128xf32>
    %50 = arith.mulf %48, %49 : vector<32x128xf32>
    %51 = arith.addf %45, %50 : vector<32x128xf32>
    %52 = vector.extract_strided_slice %2 {offsets = [0, 4], sizes = [32, 1], strides = [1, 1]} : vector<32x16xf32> to vector<32x1xf32>
    %53 = vector.extract_strided_slice %25 {offsets = [4, 0], sizes = [1, 128], strides = [1, 1]} : vector<16x128xf32> to vector<1x128xf32>
    %54 = vector.broadcast %52 : vector<32x1xf32> to vector<32x128xf32>
    %55 = vector.broadcast %53 : vector<1x128xf32> to vector<32x128xf32>
    %56 = arith.mulf %54, %55 : vector<32x128xf32>
    %57 = arith.addf %51, %56 : vector<32x128xf32>
    %58 = vector.extract_strided_slice %2 {offsets = [0, 5], sizes = [32, 1], strides = [1, 1]} : vector<32x16xf32> to vector<32x1xf32>
    %59 = vector.extract_strided_slice %25 {offsets = [5, 0], sizes = [1, 128], strides = [1, 1]} : vector<16x128xf32> to vector<1x128xf32>
    %60 = vector.broadcast %58 : vector<32x1xf32> to vector<32x128xf32>
    %61 = vector.broadcast %59 : vector<1x128xf32> to vector<32x128xf32>
    %62 = arith.mulf %60, %61 : vector<32x128xf32>
    %63 = arith.addf %57, %62 : vector<32x128xf32>
    %64 = vector.extract_strided_slice %2 {offsets = [0, 6], sizes = [32, 1], strides = [1, 1]} : vector<32x16xf32> to vector<32x1xf32>
    %65 = vector.extract_strided_slice %25 {offsets = [6, 0], sizes = [1, 128], strides = [1, 1]} : vector<16x128xf32> to vector<1x128xf32>
    %66 = vector.broadcast %64 : vector<32x1xf32> to vector<32x128xf32>
    %67 = vector.broadcast %65 : vector<1x128xf32> to vector<32x128xf32>
    %68 = arith.mulf %66, %67 : vector<32x128xf32>
    %69 = arith.addf %63, %68 : vector<32x128xf32>
    %70 = vector.extract_strided_slice %2 {offsets = [0, 7], sizes = [32, 1], strides = [1, 1]} : vector<32x16xf32> to vector<32x1xf32>
    %71 = vector.extract_strided_slice %25 {offsets = [7, 0], sizes = [1, 128], strides = [1, 1]} : vector<16x128xf32> to vector<1x128xf32>
    %72 = vector.broadcast %70 : vector<32x1xf32> to vector<32x128xf32>
    %73 = vector.broadcast %71 : vector<1x128xf32> to vector<32x128xf32>
    %74 = arith.mulf %72, %73 : vector<32x128xf32>
    %75 = arith.addf %69, %74 : vector<32x128xf32>
    %76 = vector.extract_strided_slice %2 {offsets = [0, 8], sizes = [32, 1], strides = [1, 1]} : vector<32x16xf32> to vector<32x1xf32>
    %77 = vector.extract_strided_slice %25 {offsets = [8, 0], sizes = [1, 128], strides = [1, 1]} : vector<16x128xf32> to vector<1x128xf32>
    %78 = vector.broadcast %76 : vector<32x1xf32> to vector<32x128xf32>
    %79 = vector.broadcast %77 : vector<1x128xf32> to vector<32x128xf32>
    %80 = arith.mulf %78, %79 : vector<32x128xf32>
    %81 = arith.addf %75, %80 : vector<32x128xf32>
    %82 = vector.extract_strided_slice %2 {offsets = [0, 9], sizes = [32, 1], strides = [1, 1]} : vector<32x16xf32> to vector<32x1xf32>
    %83 = vector.extract_strided_slice %25 {offsets = [9, 0], sizes = [1, 128], strides = [1, 1]} : vector<16x128xf32> to vector<1x128xf32>
    %84 = vector.broadcast %82 : vector<32x1xf32> to vector<32x128xf32>
    %85 = vector.broadcast %83 : vector<1x128xf32> to vector<32x128xf32>
    %86 = arith.mulf %84, %85 : vector<32x128xf32>
    %87 = arith.addf %81, %86 : vector<32x128xf32>
    %88 = vector.extract_strided_slice %2 {offsets = [0, 10], sizes = [32, 1], strides = [1, 1]} : vector<32x16xf32> to vector<32x1xf32>
    %89 = vector.extract_strided_slice %25 {offsets = [10, 0], sizes = [1, 128], strides = [1, 1]} : vector<16x128xf32> to vector<1x128xf32>
    %90 = vector.broadcast %88 : vector<32x1xf32> to vector<32x128xf32>
    %91 = vector.broadcast %89 : vector<1x128xf32> to vector<32x128xf32>
    %92 = arith.mulf %90, %91 : vector<32x128xf32>
    %93 = arith.addf %87, %92 : vector<32x128xf32>
    %94 = vector.extract_strided_slice %2 {offsets = [0, 11], sizes = [32, 1], strides = [1, 1]} : vector<32x16xf32> to vector<32x1xf32>
    %95 = vector.extract_strided_slice %25 {offsets = [11, 0], sizes = [1, 128], strides = [1, 1]} : vector<16x128xf32> to vector<1x128xf32>
    %96 = vector.broadcast %94 : vector<32x1xf32> to vector<32x128xf32>
    %97 = vector.broadcast %95 : vector<1x128xf32> to vector<32x128xf32>
    %98 = arith.mulf %96, %97 : vector<32x128xf32>
    %99 = arith.addf %93, %98 : vector<32x128xf32>
    %100 = vector.extract_strided_slice %2 {offsets = [0, 12], sizes = [32, 1], strides = [1, 1]} : vector<32x16xf32> to vector<32x1xf32>
    %101 = vector.extract_strided_slice %25 {offsets = [12, 0], sizes = [1, 128], strides = [1, 1]} : vector<16x128xf32> to vector<1x128xf32>
    %102 = vector.broadcast %100 : vector<32x1xf32> to vector<32x128xf32>
    %103 = vector.broadcast %101 : vector<1x128xf32> to vector<32x128xf32>
    %104 = arith.mulf %102, %103 : vector<32x128xf32>
    %105 = arith.addf %99, %104 : vector<32x128xf32>
    %106 = vector.extract_strided_slice %2 {offsets = [0, 13], sizes = [32, 1], strides = [1, 1]} : vector<32x16xf32> to vector<32x1xf32>
    %107 = vector.extract_strided_slice %25 {offsets = [13, 0], sizes = [1, 128], strides = [1, 1]} : vector<16x128xf32> to vector<1x128xf32>
    %108 = vector.broadcast %106 : vector<32x1xf32> to vector<32x128xf32>
    %109 = vector.broadcast %107 : vector<1x128xf32> to vector<32x128xf32>
    %110 = arith.mulf %108, %109 : vector<32x128xf32>
    %111 = arith.addf %105, %110 : vector<32x128xf32>
    %112 = vector.extract_strided_slice %2 {offsets = [0, 14], sizes = [32, 1], strides = [1, 1]} : vector<32x16xf32> to vector<32x1xf32>
    %113 = vector.extract_strided_slice %25 {offsets = [14, 0], sizes = [1, 128], strides = [1, 1]} : vector<16x128xf32> to vector<1x128xf32>
    %114 = vector.broadcast %112 : vector<32x1xf32> to vector<32x128xf32>
    %115 = vector.broadcast %113 : vector<1x128xf32> to vector<32x128xf32>
    %116 = arith.mulf %114, %115 : vector<32x128xf32>
    %117 = arith.addf %111, %116 : vector<32x128xf32>
    %118 = vector.extract_strided_slice %2 {offsets = [0, 15], sizes = [32, 1], strides = [1, 1]} : vector<32x16xf32> to vector<32x1xf32>
    %119 = vector.extract_strided_slice %25 {offsets = [15, 0], sizes = [1, 128], strides = [1, 1]} : vector<16x128xf32> to vector<1x128xf32>
    %120 = vector.broadcast %118 : vector<32x1xf32> to vector<32x128xf32>
    %121 = vector.broadcast %119 : vector<1x128xf32> to vector<32x128xf32>
    %122 = arith.mulf %120, %121 : vector<32x128xf32>
    %123 = arith.addf %117, %122 : vector<32x128xf32>
    %cst_11 = arith.constant 0.000000e+00 : f32
    %124 = vector.broadcast %cst_11 : f32 to vector<32x128xf32>
    %125 = arith.maximumf %123, %124 : vector<32x128xf32>
    %126 = vector.broadcast %3 : vector<32x1xf32> to vector<32x128xf32>
    %127 = arith.mulf %125, %126 : vector<32x128xf32>
    %cst_12 = arith.constant dense<0.000000e+00> : vector<128xf32>
    %128 = vector.multi_reduction <add>, %127, %cst_12 [0] : vector<32x128xf32> to vector<128xf32>
    %129 = vector.shape_cast %128 : vector<128xf32> to vector<1x128xf32>
    %c0_13 = arith.constant 0 : index
    %c0_14 = arith.constant 0 : index
    %130 = vector.load %arg7[%c0_13, %c0_14] : memref<1x1xf32, #tpu.memory_space<vmem>>, vector<1x1xf32>
    %131 = vector.broadcast %130 : vector<1x1xf32> to vector<1x128xf32>
    %132 = arith.addf %129, %131 : vector<1x128xf32>
    %c0_15 = arith.constant 0 : index
    %c0_16 = arith.constant 0 : index
    %133 = vector.load %arg8[%c0_15, %c0_16] : memref<1x128xf32, #tpu.memory_space<vmem>>, vector<1x128xf32>
    tpu.vector_store %arg8[%c0_15, %c0_16], %132 {strides = array<i32>} : memref<1x128xf32, #tpu.memory_space<vmem>>, vector<1x128xf32>,
    return
  }
  func.func @transform_0(%arg0: i32) -> (i32, i32) {
    %c0_i32 = arith.constant 0 : i32
    %c0_i32_0 = arith.constant 0 : i32
    return %c0_i32, %arg0 : i32, i32
  }
  func.func @transform_1(%arg0: i32) -> (i32, i32) {
    %c0_i32 = arith.constant 0 : i32
    %c0_i32_0 = arith.constant 0 : i32
    %c0_i32_1 = arith.constant 0 : i32
    return %c0_i32, %c0_i32_0 : i32, i32
  }
  func.func @transform_2(%arg0: i32) -> (i32, i32) {
    %c0_i32 = arith.constant 0 : i32
    %c0_i32_0 = arith.constant 0 : i32
    %c0_i32_1 = arith.constant 0 : i32
    return %c0_i32, %c0_i32_0 : i32, i32
  }
  func.func @transform_3(%arg0: i32) -> (i32, i32) {
    %c0_i32 = arith.constant 0 : i32
    %c0_i32_0 = arith.constant 0 : i32
    %c0_i32_1 = arith.constant 0 : i32
    return %c0_i32, %c0_i32_0 : i32, i32
  }
  func.func @transform_4(%arg0: i32) -> (i32, i32) {
    %c0_i32 = arith.constant 0 : i32
    %c0_i32_0 = arith.constant 0 : i32
    %c0_i32_1 = arith.constant 0 : i32
    return %c0_i32, %c0_i32_0 : i32, i32
  }
  func.func @transform_5(%arg0: i32) -> (i32, i32) {
    %c0_i32 = arith.constant 0 : i32
    %c0_i32_0 = arith.constant 0 : i32
    %c0_i32_1 = arith.constant 0 : i32
    return %c0_i32, %c0_i32_0 : i32, i32
  }
  func.func @transform_6(%arg0: i32) -> (i32, i32) {
    %c0_i32 = arith.constant 0 : i32
    %c0_i32_0 = arith.constant 0 : i32
    %c0_i32_1 = arith.constant 0 : i32
    return %c0_i32, %c0_i32_0 : i32, i32
  }
  func.func @transform_7(%arg0: i32) -> (i32, i32) {
    %c0_i32 = arith.constant 0 : i32
    %c0_i32_0 = arith.constant 0 : i32
    return %c0_i32, %arg0 : i32, i32
  }
}

</mosaic_0001>

<bundles_post_ra>
// kernel: net_forward.1
= control target key start
LH: loop header
LB: loop body
LE: loop exit
PB: predicated region body
PF: predicated region fallthrough
CT: control target
= control target key end

     0   :  { %v639_v0 = vmov 1   ;;  %v640_v1 = vmov 0   ;;  %v641_v8 = vmov 2   ;;  %v642_v15 = vmov 3   ;;  %s878_s2 = inlined_call_operand.vmem [shape: f32[16,1], index: 2, kind: input, shape index: {}]   ;;  %s879_s1 = inlined_call_operand.vmem [shape: f32[16,3], index: 1, kind: input, shape index: {}]   ;;  %s880_s3 = inlined_call_operand.vmem [shape: f32[32,16], index: 3, kind: input, shape index: {}]   ;;  %s881_s4 = inlined_call_operand.vmem [shape: f32[32,1], index: 4, kind: input, shape index: {}]   ;;  %s882_s0 = inlined_call_operand.vmem [shape: f32[3,128], index: 0, kind: input, shape index: {}]   ;;  %s883_s5 = inlined_call_operand.vmem [shape: f32[32,1], index: 5, kind: input, shape index: {}]   ;;  %s884_s6 = inlined_call_operand.<no memory space> [shape: f32[1,1], index: 6, kind: input, shape index: {}]   ;;  %s885_s7 = inlined_call_operand.vmem [shape: f32[1,128], index: 7, kind: output, shape index: {}]  }
   0x1   :  { %590 = vset.pattern.permute.xlu2 %v639_v0  ;;  %589 = vset.pattern.permute.xlu1 %v640_v1  ;;  %v39_v2 = vld [vmem:[%s878_s2] sm:$0xff]  ;;  %v40_v4 = vld [vmem:[%s878_s2 + $0x8] sm:$0xff]  ;;  %v712_v6 = vld [vmem:[%s880_s3 + $0x18] sm:$0xff]  ;;  %v643_v16 = vmov 4   ;;  %v644_v17 = vmov 6   ;;  %v645_v18 = vmov 7  }
   0x2   :  { %v29_v3 = vld [vmem:[%s879_s1] sm:$0xff]  ;;  %588 = vset.pattern.permute.xlu0 %v640_v1  ;;  %56 = vperm.xlu1 %589, %v39_v2   ;;  %v30_v5 = vld [vmem:[%s879_s1 + $0x8] sm:$0xff]  ;;  %v725_v9 = vld [vmem:[%s880_s3 + $0x10] sm:$0xff]  ;;  %v646_v19 = vmov 8   ;;  %v647_v21 = vmov 9   ;;  %v648_v23 = vmov 5  }
   0x3   :  { %67 = vperm.xlu2 %590, %v29_v3   ;;  %43 = vperm.xlu0 %588, %v29_v3   ;;  %v717_v7 = vld [vmem:[%s880_s3] sm:$0xff]  ;;  %v730_v10 = vld [vmem:[%s880_s3 + $0x8] sm:$0xff]  ;;  %v97_v13 = vld [vmem:[%s881_s4 + $0x18] sm:$0xff]  ;;  %v649_v24 = vmov 11   ;;  %v650_v30 = vmov 12   ;;  %v651_v39 = vmov 13  }
   0x4   :  { %v95_v11 = vld [vmem:[%s881_s4 + $0x8] sm:$0xff]  ;;  %v94_v12 = vld [vmem:[%s881_s4] sm:$0xff]  ;;  %v96_v14 = vld [vmem:[%s881_s4 + $0x10] sm:$0xff]  ;;  %v652_v50 = vmov 15  }
   0x5   :  { %v28_v26 = vld [vmem:[%s882_s0] sm:$0x7] }
   0x6   :  { %v74_v27 = vperm.slane %v28_v26, 1  ;;  %v51_v28 = vperm.slane %v28_v26, 0  ;;  %v87_v45 = vperm.slane %v28_v26, 2 }
   0xa   :  { %61 = vperm.xlu1 %589, %v40_v4  }
   0xb   :  { %71 = vperm.xlu2 %590, %v30_v5   ;;  %48 = vperm.xlu0 %588, %v30_v5  }
  0x12   :  { %591 = vset.pattern.permute.xlu1 %v641_v8 }
  0x13   :  { %592 = vset.pattern.permute.xlu2 %v640_v1  ;;  %115 = vperm.xlu0 %588, %v712_v6  }
  0x14   :  { %84 = vperm.xlu1 %591, %v30_v5   ;;  %100 = vperm.xlu2 %592, %v717_v7  }
  0x1b   :  { %594 = vset.pattern.permute.xlu0 %v639_v0 }
  0x1c   :  { %593 = vset.pattern.permute.xlu1 %v640_v1  ;;  %110 = vperm.xlu2 %592, %v725_v9  }
  0x1d   :  { %148 = vperm.xlu0 %594, %v717_v7   ;;  %105 = vperm.xlu1 %593, %v730_v10  }
  0x24   :  { %130 = vperm.xlu2 %592, %v95_v11  }
  0x25   :  { %595 = vset.pattern.permute.xlu0 %v641_v8  ;;  %125 = vperm.xlu1 %593, %v94_v12  }
  0x26   :  { %80 = vperm.xlu0 %595, %v29_v3  }
  0x2c   :  { %140 = vperm.xlu2 %592, %v97_v13  }
  0x2d   :  { %135 = vperm.xlu1 %593, %v96_v14  }
  0x2e   :  { %177 = vperm.xlu0 %595, %v730_v10  }
  0x34   :  { %597 = vset.pattern.permute.xlu2 %v639_v0 }
  0x35   :  { %596 = vset.pattern.permute.xlu1 %v639_v0  ;;  %156 = vperm.xlu2 %597, %v725_v9  }
  0x36   :  { %602 = vset.pattern.permute.xlu0 %v642_v15  ;;  %152 = vperm.xlu1 %596, %v730_v10  }
  0x37   :  { %206 = vperm.xlu0 %602, %v725_v9  }
  0x3d   :  { %598 = vset.pattern.permute.xlu2 %v641_v8 }
  0x3e   :  { %160 = vperm.xlu1 %596, %v712_v6   ;;  %173 = vperm.xlu2 %598, %v717_v7  }
  0x3f   :  { %605 = vset.pattern.permute.xlu0 %v643_v16 }
  0x40   :  { %235 = vperm.xlu0 %605, %v712_v6  }
  0x46   :  { %599 = vset.pattern.permute.xlu1 %v641_v8  ;;  %185 = vperm.xlu2 %598, %v712_v6  }
  0x47   :  { %181 = vperm.xlu1 %599, %v725_v9  }
  0x48   :  { %608 = vset.pattern.permute.xlu0 %v644_v17 }
  0x49   :  { %273 = vperm.xlu0 %608, %v717_v7  }
  0x4e   :  { %601 = vset.pattern.permute.xlu2 %v642_v15 }
  0x4f   :  { %600 = vset.pattern.permute.xlu1 %v642_v15  ;;  %202 = vperm.xlu2 %601, %v730_v10  }
  0x50   :  { %198 = vperm.xlu1 %600, %v717_v7  }
  0x51   :  { %612 = vset.pattern.permute.xlu0 %v645_v18 }
  0x52   :  { %302 = vperm.xlu0 %612, %v730_v10  }
  0x57   :  { %603 = vset.pattern.permute.xlu2 %v643_v16 }
  0x58   :  { %210 = vperm.xlu1 %600, %v712_v6   ;;  %223 = vperm.xlu2 %603, %v717_v7  }
  0x5a   :  { %616 = vset.pattern.permute.xlu0 %v646_v19 }
  0x5b   :  { %331 = vperm.xlu0 %616, %v725_v9  }
  0x5d   :  { %v68_v20 = vpop.permute.xlu2 %67 }
  0x5e   :  { %v75_v32 = vmul.f32 %v74_v27, %v68_v20 }
  0x60   :  { %604 = vset.pattern.permute.xlu1 %v643_v16  ;;  %231 = vperm.xlu2 %603, %v725_v9  }
  0x61   :  { %227 = vperm.xlu1 %604, %v730_v10  }
  0x63   :  { %619 = vset.pattern.permute.xlu0 %v647_v21 }
  0x64   :  { %360 = vperm.xlu0 %619, %v712_v6  }
  0x65   :  { %v72_v22 = vpop.permute.xlu2 %71 }
  0x66   :  { %v76_v42 = vmul.f32 %v74_v27, %v72_v22 }
  0x68   :  { %607 = vset.pattern.permute.xlu2 %v648_v23 }
  0x69   :  { %606 = vset.pattern.permute.xlu1 %v648_v23  ;;  %252 = vperm.xlu2 %607, %v730_v10  }
  0x6a   :  { %248 = vperm.xlu1 %606, %v717_v7  }
  0x6c   :  { %622 = vset.pattern.permute.xlu0 %v649_v24 }
  0x6d   :  { %398 = vperm.xlu0 %622, %v717_v7  }
  0x6e   :  { %v774_v25 = vpop.permute.xlu2 %100 }
  0x71   :  { %260 = vperm.xlu2 %607, %v712_v6  }
  0x72   :  { %256 = vperm.xlu1 %606, %v725_v9  }
  0x74   :  { %v57_v29 = vpop.permute.xlu1 %56 }
  0x75   :  { %626 = vset.pattern.permute.xlu0 %v650_v30  ;;  %v44_v31 = vpop.permute.xlu0 %43 }
  0x76   :  { %427 = vperm.xlu0 %626, %v730_v10   ;;  %v52_v33 = vmul.f32 %v51_v28, %v44_v31  ;;  %v111_v34 = vpop.permute.xlu2 %110 }
  0x78   :  { %v64_v35 = vadd.f32 %v57_v29, %v52_v33 }
  0x79   :  { %610 = vset.pattern.permute.xlu2 %v644_v17 }
  0x7a   :  { %609 = vset.pattern.permute.xlu1 %v644_v17  ;;  %281 = vperm.xlu2 %610, %v725_v9   ;;  %v77_v36 = vadd.f32 %v75_v32, %v64_v35 }
  0x7b   :  { %277 = vperm.xlu1 %609, %v730_v10  }
  0x7c   :  { %v62_v37 = vpop.permute.xlu1 %61 }
  0x7d   :  { %v49_v38 = vpop.permute.xlu0 %48 }
  0x7e   :  { %630 = vset.pattern.permute.xlu0 %v651_v39  ;;  %v53_v40 = vmul.f32 %v51_v28, %v49_v38  ;;  %v131_v41 = vpop.permute.xlu2 %130 }
  0x7f   :  { %456 = vperm.xlu0 %630, %v725_v9  }
  0x80   :  { %v65_v43 = vadd.f32 %v62_v37, %v53_v40 }
  0x82   :  { %611 = vset.pattern.permute.xlu2 %v645_v18  ;;  %v78_v44 = vadd.f32 %v76_v42, %v65_v43 }
  0x83   :  { %285 = vperm.xlu1 %609, %v712_v6   ;;  %298 = vperm.xlu2 %611, %v717_v7  }
  0x85   :  { %v116_v46 = vpop.permute.xlu0 %115 }
  0x86   :  { %v85_v47 = vpop.permute.xlu1 %84  ;;  %v141_v48 = vpop.permute.xlu2 %140 }
  0x87   :  { %v89_v49 = vmul.f32 %v87_v45, %v85_v47  ;;  %633 = vset.pattern.permute.xlu0 %v652_v50 }
  0x88   :  { %498 = vperm.xlu0 %633, %v717_v7  }
  0x89   :  { %v792_v51 = vadd.f32 %v89_v49, %v78_v44 }
  0x8b   :  { %613 = vset.pattern.permute.xlu1 %v645_v18  ;;  %310 = vperm.xlu2 %611, %v712_v6  }
  0x8c   :  { %306 = vperm.xlu1 %613, %v725_v9  }
  0x8f   :  { %v106_v52 = vpop.permute.xlu1 %105  ;;  %v149_v53 = vpop.permute.xlu0 %148 }
  0x90   :  { %v157_v54 = vpop.permute.xlu2 %156  ;;  %636 = vset.pattern.permute.xlu0 %v640_v1 }
  0x93   :  { %615 = vset.pattern.permute.xlu2 %v646_v19 }
  0x94   :  { %614 = vset.pattern.permute.xlu1 %v646_v19  ;;  %327 = vperm.xlu2 %615, %v730_v10  }
  0x95   :  { %323 = vperm.xlu1 %614, %v717_v7  }
  0x97   :  { %v126_v55 = vpop.permute.xlu1 %125 }
  0x98   :  { %v81_v56 = vpop.permute.xlu0 %80  ;;  %v174_v57 = vpop.permute.xlu2 %173 }
  0x99   :  { %v88_v58 = vmul.f32 %v87_v45, %v81_v56 }
  0x9b   :  { %v90_v59 = vadd.f32 %v88_v58, %v77_v36 }
  0x9c   :  { %617 = vset.pattern.permute.xlu2 %v647_v21 }
  0x9d   :  { %v803_v60 = vmax.f32 %v90_v59, 0.0  ;;  %335 = vperm.xlu1 %614, %v712_v6   ;;  %348 = vperm.xlu2 %617, %v717_v7  }
  0x9f   :  { %v118_v61 = vperm.slane %v803_v60, 0  ;;  %v163_v62 = vperm.slane %v803_v60, 1  ;;  %v188_v63 = vperm.slane %v803_v60, 2  ;;  %v136_v0 = vpop.permute.xlu1 %135  ;;  %v213_v26 = vperm.slane %v803_v60, 3 }
  0xa0   :  { %v186_v2 = vpop.permute.xlu2 %185  ;;  %v178_v23 = vpop.permute.xlu0 %177  ;;  %v238_v37 = vperm.slane %v803_v60, 4 }
  0xa1   :  { %v119_v3 = vmul.f32 %v118_v61, %v774_v25  ;;  %v164_v4 = vmul.f32 %v163_v62, %v149_v53  ;;  %v189_v5 = vmul.f32 %v188_v63, %v174_v57  ;;  %v121_v8 = vmul.f32 %v118_v61, %v111_v34 }
  0xa2   :  { %v166_v11 = vmul.f32 %v163_v62, %v157_v54  ;;  %v192_v12 = vmul.f32 %v188_v63, %v186_v2  ;;  %v120_v13 = vmul.f32 %v118_v61, %v106_v52  ;;  %v122_v16 = vmul.f32 %v118_v61, %v116_v46  ;;  %v35_v61 = vld [vmem:[%s883_s5] sm:$0xff] }
  0xa3   :  { %v143_v14 = vadd.f32 %v126_v55, %v119_v3  ;;  %v145_v15 = vadd.f32 %v136_v0, %v121_v8  ;;  %v190_v31 = vmul.f32 %v188_v63, %v178_v23  ;;  %v653_v34 = vmov 10   ;;  %528 = vperm.xlu0 %636, %v35_v61  }
  0xa4   :  { %v144_v17 = vadd.f32 %v131_v41, %v120_v13  ;;  %v146_v20 = vadd.f32 %v141_v48, %v122_v16  ;;  %v263_v55 = vperm.slane %v803_v60, 5 }
  0xa5   :  { %v168_v18 = vadd.f32 %v164_v4, %v143_v14  ;;  %v170_v19 = vadd.f32 %v166_v11, %v145_v15  ;;  %618 = vset.pattern.permute.xlu1 %v647_v21  ;;  %356 = vperm.xlu2 %617, %v725_v9  }
  0xa6   :  { %352 = vperm.xlu1 %618, %v730_v10  }
  0xa7   :  { %v193_v22 = vadd.f32 %v189_v5, %v168_v18 }
  0xa8   :  { %v153_v25 = vpop.permute.xlu1 %152 }
  0xa9   :  { %v165_v27 = vmul.f32 %v163_v62, %v153_v25  ;;  %v203_v28 = vpop.permute.xlu2 %202  ;;  %v207_v43 = vpop.permute.xlu0 %206 }
  0xaa   :  { %v215_v29 = vmul.f32 %v213_v26, %v203_v28  ;;  %v216_v48 = vmul.f32 %v213_v26, %v207_v43 }
  0xab   :  { %v169_v32 = vadd.f32 %v165_v27, %v144_v17 }
  0xad   :  { %v194_v33 = vadd.f32 %v190_v31, %v169_v32  ;;  %621 = vset.pattern.permute.xlu2 %v653_v34 }
  0xae   :  { %620 = vset.pattern.permute.xlu1 %v653_v34  ;;  %377 = vperm.xlu2 %621, %v730_v10  }
  0xaf   :  { %v219_v21 = vadd.f32 %v215_v29, %v194_v33  ;;  %373 = vperm.xlu1 %620, %v717_v7   ;;  %v654_v29 = vmov 14  }
  0xb0   :  { %v161_v35 = vpop.permute.xlu1 %160 }
  0xb1   :  { %v167_v36 = vmul.f32 %v163_v62, %v161_v35 }
  0xb2   :  { %v224_v38 = vpop.permute.xlu2 %223 }
  0xb3   :  { %v171_v40 = vadd.f32 %v167_v36, %v146_v20  ;;  %v239_v41 = vmul.f32 %v238_v37, %v224_v38 }
  0xb5   :  { %v196_v42 = vadd.f32 %v192_v12, %v171_v40  ;;  %v288_v12 = vperm.slane %v803_v60, 6 }
  0xb6   :  { %385 = vperm.xlu2 %621, %v712_v6  }
  0xb7   :  { %381 = vperm.xlu1 %620, %v725_v9  }
  0xb9   :  { %v182_v44 = vpop.permute.xlu1 %181 }
  0xba   :  { %v191_v45 = vmul.f32 %v188_v63, %v182_v44  ;;  %v232_v46 = vpop.permute.xlu2 %231 }
  0xbb   :  { %v241_v47 = vmul.f32 %v238_v37, %v232_v46 }
  0xbc   :  { %v195_v49 = vadd.f32 %v191_v45, %v170_v19  ;;  %v313_v19 = vperm.slane %v803_v60, 7  ;;  %v843_v60 = vmax.f32 %v792_v51, 0.0 }
  0xbe   :  { %v220_v52 = vadd.f32 %v216_v48, %v195_v49  ;;  %624 = vset.pattern.permute.xlu2 %v649_v24  ;;  %v363_v46 = vperm.slane %v843_v60, 1 }
  0xbf   :  { %623 = vset.pattern.permute.xlu1 %v649_v24  ;;  %406 = vperm.xlu2 %624, %v725_v9   ;;  %v236_v24 = vpop.permute.xlu0 %235 }
  0xc0   :  { %v245_v53 = vadd.f32 %v241_v47, %v220_v52  ;;  %402 = vperm.xlu1 %623, %v730_v10   ;;  %v242_v4 = vmul.f32 %v238_v37, %v236_v24 }
  0xc2   :  { %v199_v54 = vpop.permute.xlu1 %198 }
  0xc3   :  { %v214_v56 = vmul.f32 %v213_v26, %v199_v54  ;;  %v253_v57 = vpop.permute.xlu2 %252  ;;  %v12_v54 = vstv %s884_s6 }
  0xc4   :  { %v265_v58 = vmul.f32 %v263_v55, %v253_v57  ;;  %13 = vst [vmem:[#allocation2] sm:$0x1] %v12_v54 }
  0xc5   :  { %v218_v59 = vadd.f32 %v214_v56, %v193_v22 }
  0xc7   :  { %625 = vset.pattern.permute.xlu2 %v650_v30  ;;  %v243_v62 = vadd.f32 %v239_v41, %v218_v59 }
  0xc8   :  { %410 = vperm.xlu1 %623, %v712_v6   ;;  %423 = vperm.xlu2 %625, %v717_v7  }
  0xca   :  { %v211_v63 = vpop.permute.xlu1 %210 }
  0xcb   :  { %v217_v0 = vmul.f32 %v213_v26, %v211_v63  ;;  %v261_v2 = vpop.permute.xlu2 %260 }
  0xcc   :  { %v267_v3 = vmul.f32 %v263_v55, %v261_v2  ;;  %v559_v2 = vld [vmem:[#allocation2] sm:$0x1] }
  0xcd   :  { %v221_v5 = vadd.f32 %v217_v0, %v196_v42 }
  0xcf   :  { %v246_v8 = vadd.f32 %v242_v4, %v221_v5  ;;  %v38_v4 = vld [vmem:[%s883_s5 + $0x18] sm:$0xff] }
  0xd0   :  { %627 = vset.pattern.permute.xlu1 %v650_v30  ;;  %435 = vperm.xlu2 %625, %v712_v6   ;;  %v274_v30 = vpop.permute.xlu0 %273 }
  0xd1   :  { %v271_v11 = vadd.f32 %v267_v3, %v246_v8  ;;  %431 = vperm.xlu1 %627, %v725_v9   ;;  %v289_v26 = vmul.f32 %v288_v12, %v274_v30 }
  0xd3   :  { %v228_v13 = vpop.permute.xlu1 %227 }
  0xd4   :  { %v240_v14 = vmul.f32 %v238_v37, %v228_v13  ;;  %v282_v15 = vpop.permute.xlu2 %281  ;;  %v338_v37 = vperm.slane %v843_v60, 0 }
  0xd5   :  { %v291_v16 = vmul.f32 %v288_v12, %v282_v15 }
  0xd6   :  { %v244_v17 = vadd.f32 %v240_v14, %v219_v21  ;;  %v388_v14 = vperm.slane %v843_v60, 2 }
  0xd8   :  { %629 = vset.pattern.permute.xlu2 %v651_v39  ;;  %v269_v18 = vadd.f32 %v265_v58, %v244_v17  ;;  %v303_v36 = vpop.permute.xlu0 %302 }
  0xd9   :  { %628 = vset.pattern.permute.xlu1 %v651_v39  ;;  %452 = vperm.xlu2 %629, %v730_v10   ;;  %v315_v42 = vmul.f32 %v313_v19, %v303_v36 }
  0xda   :  { %448 = vperm.xlu1 %628, %v717_v7  }
  0xdc   :  { %v249_v20 = vpop.permute.xlu1 %248 }
  0xdd   :  { %v264_v22 = vmul.f32 %v263_v55, %v249_v20  ;;  %v299_v23 = vpop.permute.xlu2 %298 }
  0xde   :  { %v314_v25 = vmul.f32 %v313_v19, %v299_v23 }
  0xdf   :  { %v268_v27 = vadd.f32 %v264_v22, %v243_v62 }
  0xe1   :  { %v293_v28 = vadd.f32 %v289_v26, %v268_v27  ;;  %631 = vset.pattern.permute.xlu2 %v654_v29 }
  0xe2   :  { %460 = vperm.xlu1 %628, %v712_v6   ;;  %473 = vperm.xlu2 %631, %v717_v7  }
  0xe3   :  { %v318_v39 = vadd.f32 %v314_v25, %v293_v28  ;;  %v413_v28 = vperm.slane %v843_v60, 3 }
  0xe4   :  { %v257_v31 = vpop.permute.xlu1 %256 }
  0xe5   :  { %v266_v32 = vmul.f32 %v263_v55, %v257_v31  ;;  %v311_v33 = vpop.permute.xlu2 %310  ;;  %v332_v55 = vpop.permute.xlu0 %331 }
  0xe6   :  { %v317_v34 = vmul.f32 %v313_v19, %v311_v33  ;;  %v341_v59 = vmul.f32 %v338_v37, %v332_v55 }
  0xe7   :  { %v270_v21 = vadd.f32 %v266_v32, %v245_v53  ;;  %v438_v32 = vperm.slane %v843_v60, 4 }
  0xe9   :  { %v295_v35 = vadd.f32 %v291_v16, %v270_v21 }
  0xea   :  { %632 = vset.pattern.permute.xlu1 %v654_v29  ;;  %481 = vperm.xlu2 %631, %v725_v9  }
  0xeb   :  { %477 = vperm.xlu1 %632, %v730_v10  }
  0xed   :  { %v278_v38 = vpop.permute.xlu1 %277  ;;  %v361_v8 = vpop.permute.xlu0 %360 }
  0xee   :  { %v290_v7 = vmul.f32 %v288_v12, %v278_v38  ;;  %v328_v40 = vpop.permute.xlu2 %327 }
  0xef   :  { %v340_v41 = vmul.f32 %v338_v37, %v328_v40 }
  0xf0   :  { %v294_v43 = vadd.f32 %v290_v7, %v269_v18 }
  0xf2   :  { %v319_v44 = vadd.f32 %v315_v42, %v294_v43  ;;  %485 = vperm.xlu2 %631, %v712_v6  }
  0xf3   :  { %634 = vset.pattern.permute.xlu1 %v652_v50 }
  0xf4   :  { %v344_v51 = vadd.f32 %v340_v41, %v319_v44  ;;  %502 = vperm.xlu1 %634, %v730_v10  }
  0xf5   :  { %v286_v45 = vpop.permute.xlu1 %285  ;;  %v399_v26 = vpop.permute.xlu0 %398 }
  0xf6   :  { %v292_v47 = vmul.f32 %v288_v12, %v286_v45  ;;  %v414_v31 = vmul.f32 %v413_v28, %v399_v26 }
  0xf7   :  { %v349_v48 = vpop.permute.xlu2 %348 }
  0xf8   :  { %v296_v49 = vadd.f32 %v292_v47, %v271_v11  ;;  %v364_v52 = vmul.f32 %v363_v46, %v349_v48 }
  0xfa   :  { %635 = vset.pattern.permute.xlu2 %v652_v50  ;;  %v321_v53 = vadd.f32 %v317_v34, %v296_v49  ;;  %v37_v50 = vld [vmem:[%s883_s5 + $0x10] sm:$0xff] }
  0xfb   :  { %510 = vperm.xlu2 %635, %v712_v6   ;;  %v36_v6 = vld [vmem:[%s883_s5 + $0x8] sm:$0xff] }
  0xfc   :  { %506 = vperm.xlu1 %634, %v725_v9  }
  0xfd   :  { %v428_v42 = vpop.permute.xlu0 %427 }
  0xfe   :  { %v307_v10 = vpop.permute.xlu1 %306  ;;  %v440_v45 = vmul.f32 %v438_v32, %v428_v42 }
  0xff   :  { %v316_v56 = vmul.f32 %v313_v19, %v307_v10  ;;  %v357_v57 = vpop.permute.xlu2 %356 }
 0x100   :  { %v366_v58 = vmul.f32 %v363_v46, %v357_v57 }
 0x101   :  { %v320_v61 = vadd.f32 %v316_v56, %v295_v35 }
 0x103   :  { %v345_v9 = vadd.f32 %v341_v59, %v320_v61  ;;  %638 = vset.pattern.permute.xlu2 %v640_v1 }
 0x104   :  { %637 = vset.pattern.permute.xlu1 %v640_v1  ;;  %538 = vperm.xlu2 %638, %v37_v50   ;;  %v367_v1 = vmul.f32 %v363_v46, %v361_v8  ;;  %v513_v8 = vperm.slane %v843_v60, 7 }
 0x105   :  { %v370_v62 = vadd.f32 %v366_v58, %v345_v9  ;;  %533 = vperm.xlu1 %637, %v36_v6   ;;  %v457_v58 = vpop.permute.xlu0 %456  ;;  %v488_v9 = vperm.slane %v843_v60, 6 }
 0x107   :  { %v324_v24 = vpop.permute.xlu1 %323 }
 0x108   :  { %v339_v63 = vmul.f32 %v338_v37, %v324_v24  ;;  %v378_v0 = vpop.permute.xlu2 %377 }
 0x109   :  { %v390_v22 = vmul.f32 %v388_v14, %v378_v0 }
 0x10a   :  { %v343_v3 = vadd.f32 %v339_v63, %v318_v39 }
 0x10c   :  { %v368_v5 = vadd.f32 %v364_v52, %v343_v3  ;;  %562 = vperm.xlu2 %638, %v559_v2  }
 0x10d   :  { %543 = vperm.xlu1 %637, %v38_v4  }
 0x10f   :  { %v336_v11 = vpop.permute.xlu1 %335 }
 0x110   :  { %v342_v12 = vmul.f32 %v338_v37, %v336_v11  ;;  %v386_v13 = vpop.permute.xlu2 %385 }
 0x111   :  { %v392_v17 = vmul.f32 %v388_v14, %v386_v13 }
 0x112   :  { %v346_v15 = vadd.f32 %v342_v12, %v321_v53 }
 0x114   :  { %v371_v16 = vadd.f32 %v367_v1, %v346_v15 }
 0x116   :  { %v396_v18 = vadd.f32 %v392_v17, %v371_v16 }
 0x118   :  { %v353_v30 = vpop.permute.xlu1 %352 }
 0x119   :  { %v365_v19 = vmul.f32 %v363_v46, %v353_v30  ;;  %v407_v20 = vpop.permute.xlu2 %406  ;;  %v463_v46 = vperm.slane %v843_v60, 5 }
 0x11a   :  { %v416_v7 = vmul.f32 %v413_v28, %v407_v20 }
 0x11b   :  { %v369_v23 = vadd.f32 %v365_v19, %v344_v51  ;;  %v466_v6 = vmul.f32 %v463_v46, %v457_v58 }
 0x11d   :  { %v394_v25 = vadd.f32 %v390_v22, %v369_v23 }
 0x121   :  { %v374_v27 = vpop.permute.xlu1 %373 }
 0x122   :  { %v389_v29 = vmul.f32 %v388_v14, %v374_v27  ;;  %v424_v39 = vpop.permute.xlu2 %423 }
 0x123   :  { %v439_v21 = vmul.f32 %v438_v32, %v424_v39 }
 0x124   :  { %v393_v33 = vadd.f32 %v389_v29, %v368_v5  ;;  %v499_v5 = vpop.permute.xlu0 %498 }
 0x125   :  { %v514_v13 = vmul.f32 %v513_v8, %v499_v5 }
 0x126   :  { %v418_v34 = vadd.f32 %v414_v31, %v393_v33 }
 0x128   :  { %v443_v35 = vadd.f32 %v439_v21, %v418_v34 }
 0x129   :  { %v382_v36 = vpop.permute.xlu1 %381 }
 0x12a   :  { %v391_v37 = vmul.f32 %v388_v14, %v382_v36  ;;  %v436_v38 = vpop.permute.xlu2 %435 }
 0x12b   :  { %v442_v10 = vmul.f32 %v438_v32, %v436_v38 }
 0x12c   :  { %v395_v40 = vadd.f32 %v391_v37, %v370_v62  ;;  %v529_v33 = vpop.permute.xlu0 %528 }
 0x12e   :  { %v420_v41 = vadd.f32 %v416_v7, %v395_v40 }
 0x132   :  { %v403_v43 = vpop.permute.xlu1 %402 }
 0x133   :  { %v415_v44 = vmul.f32 %v413_v28, %v403_v43  ;;  %v453_v51 = vpop.permute.xlu2 %452 }
 0x134   :  { %v465_v49 = vmul.f32 %v463_v46, %v453_v51 }
 0x135   :  { %v419_v47 = vadd.f32 %v415_v44, %v394_v25 }
 0x137   :  { %v444_v48 = vadd.f32 %v440_v45, %v419_v47 }
 0x139   :  { %v469_v52 = vadd.f32 %v465_v49, %v444_v48 }
 0x13a   :  { %v411_v53 = vpop.permute.xlu1 %410 }
 0x13b   :  { %v417_v54 = vmul.f32 %v413_v28, %v411_v53 }
 0x13c   :  { %v474_v55 = vpop.permute.xlu2 %473 }
 0x13d   :  { %v421_v56 = vadd.f32 %v417_v54, %v396_v18  ;;  %v489_v11 = vmul.f32 %v488_v9, %v474_v55 }
 0x13f   :  { %v446_v57 = vadd.f32 %v442_v10, %v421_v56 }
 0x143   :  { %v432_v59 = vpop.permute.xlu1 %431 }
 0x144   :  { %v441_v61 = vmul.f32 %v438_v32, %v432_v59  ;;  %v482_v50 = vpop.permute.xlu2 %481 }
 0x145   :  { %v491_v63 = vmul.f32 %v488_v9, %v482_v50 }
 0x146   :  { %v445_v62 = vadd.f32 %v441_v61, %v420_v41 }
 0x148   :  { %v470_v24 = vadd.f32 %v466_v6, %v445_v62 }
 0x14a   :  { %v495_v0 = vadd.f32 %v491_v63, %v470_v24 }
 0x14c   :  { %v449_v2 = vpop.permute.xlu1 %448  ;;  %v486_v3 = vpop.permute.xlu2 %485 }
 0x14d   :  { %v464_v4 = vmul.f32 %v463_v46, %v449_v2  ;;  %v492_v18 = vmul.f32 %v488_v9, %v486_v3 }
 0x14f   :  { %v468_v12 = vadd.f32 %v464_v4, %v443_v35 }
 0x151   :  { %v493_v1 = vadd.f32 %v489_v11, %v468_v12 }
 0x153   :  { %v518_v14 = vadd.f32 %v514_v13, %v493_v1 }
 0x154   :  { %v461_v15 = vpop.permute.xlu1 %460 }
 0x155   :  { %v467_v16 = vmul.f32 %v463_v46, %v461_v15  ;;  %v511_v17 = vpop.permute.xlu2 %510  ;;  %v522_v32 = vmax.f32 %v518_v14, 0.0 }
 0x156   :  { %v517_v20 = vmul.f32 %v513_v8, %v511_v17 }
 0x157   :  { %v471_v30 = vadd.f32 %v467_v16, %v446_v57  ;;  %v546_v37 = vmul.f32 %v529_v33, %v522_v32 }
 0x159   :  { %v496_v19 = vadd.f32 %v492_v18, %v471_v30 }
 0x15b   :  { %v521_v22 = vadd.f32 %v517_v20, %v496_v19 }
 0x15d   :  { %v478_v23 = vpop.permute.xlu1 %477  ;;  %v525_v42 = vmax.f32 %v521_v22, 0.0 }
 0x15e   :  { %v490_v25 = vmul.f32 %v488_v9, %v478_v23  ;;  %v539_v35 = vpop.permute.xlu2 %538 }
 0x160   :  { %v494_v26 = vadd.f32 %v490_v25, %v469_v52 }
 0x166   :  { %v503_v27 = vpop.permute.xlu1 %502  ;;  %v563_v49 = vpop.permute.xlu2 %562 }
 0x167   :  { %v515_v28 = vmul.f32 %v513_v8, %v503_v27  ;;  %v565_v53 = vperm.slane %v563_v49, 0 }
 0x169   :  { %v519_v29 = vadd.f32 %v515_v28, %v494_v26 }
 0x16b   :  { %v523_v21 = vmax.f32 %v519_v29, 0.0 }
 0x16e   :  { %v507_v60 = vpop.permute.xlu1 %506 }
 0x16f   :  { %v516_v39 = vmul.f32 %v513_v8, %v507_v60 }
 0x171   :  { %v520_v31 = vadd.f32 %v516_v39, %v495_v0 }
 0x173   :  { %v524_v34 = vmax.f32 %v520_v31, 0.0 }
 0x175   :  { %v548_v7 = vmul.f32 %v539_v35, %v524_v34 }
 0x177   :  { %v534_v36 = vpop.permute.xlu1 %533 }
 0x178   :  { %v547_v38 = vmul.f32 %v534_v36, %v523_v21 }
 0x17a   :  { %v550_v40 = vadd.f32 %v547_v38, %v546_v37 }
 0x17c   :  { %v551_v41 = vadd.f32 %v550_v40, %v548_v7 }
 0x17f   :  { %v544_v43 = vpop.permute.xlu1 %543 }
 0x180   :  { %v549_v44 = vmul.f32 %v544_v43, %v525_v42 }
 0x182   :  { %v552_v51 = vadd.f32 %v551_v41, %v549_v44 }
 0x184   :  { %v553_v45 = vrot.slane %v552_v51, 4 }
 0x186   :  { %v554_v46 = vadd.f32 %v553_v45, %v552_v51 }
 0x188   :  { %v555_v47 = vrot.slane %v554_v46, 2 }
 0x18a   :  { %v556_v48 = vadd.f32 %v555_v47, %v554_v46 }
 0x18c   :  { %v557_v52 = vrot.slane %v556_v48, 1 }
 0x18e   :  { %v558_v54 = vadd.f32 %v557_v52, %v556_v48 }
 0x190   :  { %v566_v55 = vadd.f32 %v565_v53, %v558_v54 }
 0x192   :  { %567 = vst [vmem:[%s885_s7] sm:$0x1] %v566_v55 }

</bundles_post_ra>
